<compile_context>
chip_gen: v5e
topology: v5e:2x2
jax: 0.10.0
libtpu: 0.0.40
codegen_flags: <defaults>
</compile_context>

<pallas_src>
import jax
import jax.numpy as jnp
from jax import lax
from jax.experimental import pallas as pl
from jax.experimental.pallas import tpu as pltpu

# --- small, TPU-friendly synthetic config -----------------------------------
H = 128            # hidden size (emb_dim) -> lane aligned
S = 8              # sequence length       -> sublane aligned
B = 4              # batch (multiple of CHUNK_B)
CHUNK_B = 2        # sequences per grid step
R = CHUNK_B * S    # activation rows per grid step
F = 4 * H          # FFN intermediate size
VOCAB = 100
TYPE_VOCAB = 2
MAX_POS = 16
NUM_CLASSES = 3    # self.output_size = 3
PAD_OUT = 128      # classifier output padded to a full lane width
EPS = 1e-12
NEG = -1e9

assert B % CHUNK_B == 0

# rows of the packed [8, H] bias / layernorm tile
_BO, _LN1G, _LN1B, _B2, _LN2G, _LN2B, _BP, _BC = range(8)


def _layernorm(x, gamma, beta):
    mu = jnp.mean(x, axis=-1, keepdims=True)
    var = jnp.mean((x - mu) ** 2, axis=-1, keepdims=True)
    return (x - mu) * lax.rsqrt(var + EPS) * gamma + beta


# --- fused Pallas kernel: encoder layer + pooler + classifier head ------------
def absa_fused_kernel(x_ref, mask_ref, wqkv_ref, bqkv_ref, wo_ref,
                      w1_ref, b1_ref, w2_ref, wp_ref, wc_ref, vecs_ref,
                      out_ref):
    x = x_ref[...]                       # [R, H] f32 (chunk of flattened activations)
    mask = mask_ref[...]                 # [R, R] f32 additive bias (block-diag + key padding)
    vecs = vecs_ref[...]                 # [8, H] f32 packed bias / layernorm vectors

    bo   = vecs[_BO:_BO + 1, :]
    ln1g = vecs[_LN1G:_LN1G + 1, :]
    ln1b = vecs[_LN1B:_LN1B + 1, :]
    b2   = vecs[_B2:_B2 + 1, :]
    ln2g = vecs[_LN2G:_LN2G + 1, :]
    ln2b = vecs[_LN2B:_LN2B + 1, :]
    bp   = vecs[_BP:_BP + 1, :]
    bc   = vecs[_BC:_BC + 1, :]

    bf16 = jnp.bfloat16
    x_bf = x.astype(bf16)

    # fused QKV projection: one [R, H] x [H, 3H] matmul (1/sqrt(H) pre-folded into q cols)
    qkv = jnp.dot(x_bf, wqkv_ref[...], preferred_element_type=jnp.float32) + bqkv_ref[...]
    q_bf = qkv[:, 0 * H:1 * H].astype(bf16)   # lane-aligned 128-col slices
    k_bf = qkv[:, 1 * H:2 * H].astype(bf16)
    v_bf = qkv[:, 2 * H:3 * H].astype(bf16)

    # batched single-head self attention over the whole chunk (one score matmul,
    # one softmax, one P@V). Cross-sequence pairs are killed by the precomputed mask.
    s = lax.dot_general(q_bf, k_bf, dimension_numbers=(((1,), (1,)), ((), ())),
                        preferred_element_type=jnp.float32)                # [R, R]
    s = s + mask
    m = jnp.max(s, axis=-1, keepdims=True)
    e = jnp.exp(s - m)
    l = jnp.sum(e, axis=-1, keepdims=True)
    p = e * pl.reciprocal(l, approx=True)                                  # EUP slot
    ctx = jnp.dot(p.astype(bf16), v_bf, preferred_element_type=jnp.float32)  # [R, H]

    attn_out = jnp.dot(ctx.astype(bf16), wo_ref[...],
                       preferred_element_type=jnp.float32) + bo
    h1 = _layernorm(x + attn_out, ln1g, ln1b)

    ff = jnp.dot(h1.astype(bf16), w1_ref[...],
                 preferred_element_type=jnp.float32) + b1_ref[...]
    ff = jax.nn.gelu(ff)  # tanh approximation; HF BERT uses exact erf GELU (minor drift)
    ff = jnp.dot(ff.astype(bf16), w2_ref[...],
                 preferred_element_type=jnp.float32) + b2
    h2 = _layernorm(h1 + ff, ln2g, ln2b)                                   # [R, H]

    # BERT pooler + classifier applied to ALL rows (no CLS gather); the wrapper keeps
    # only rows [::S]. Output is a full unmasked [R, 128] tile store (lane/tile dense).
    pooled = jnp.tanh(jnp.dot(h2.astype(bf16), wp_ref[...],
                              preferred_element_type=jnp.float32) + bp)
    # nn.Dropout(0.1) in eval mode == identity
    out_ref[...] = jnp.dot(pooled.astype(bf16), wc_ref[...],
                           preferred_element_type=jnp.float32) + bc        # [R, 128]


# --- parameter init (deterministic, synthetic) --------------------------------
def init_params(key):
    ks = jax.random.split(key, 12)

    def w(k, shape, scale=0.02):
        return jax.random.normal(k, shape, jnp.float32) * scale

    wq, wk, wv = w(ks[3], (H, H)), w(ks[4], (H, H)), w(ks[5], (H, H))
    wo = w(ks[6], (H, H))
    w1, w2 = w(ks[7], (H, F)), w(ks[8], (F, H))
    wp = w(ks[9], (H, H))
    wc = w(ks[10], (H, NUM_CLASSES))

    attn_scale = 1.0 / (float(H) ** 0.5)
    # merged QKV weight with the attention scale folded into the q columns
    wqkv = jnp.concatenate([wq * attn_scale, wk, wv], axis=1)              # [H, 3H]
    bqkv = jnp.zeros((1, 3 * H), jnp.float32)

    # packed (1,H) bias / layernorm vectors -> one [8, H] tile (one vreg, one DMA)
    vecs = jnp.zeros((8, H), jnp.float32)
    vecs = vecs.at[_LN1G].set(1.0).at[_LN2G].set(1.0)   # LN gammas = 1; biases stay 0

    # classifier weight padded to 128 lane-dense output columns (extra cols are zero)
    wc_pad = jnp.zeros((H, PAD_OUT), jnp.float32).at[:, :NUM_CLASSES].set(wc)

    bf16 = jnp.bfloat16
    return {
        # embedding tables (wrapper-side glue, f32)
        "word_emb": w(ks[0], (VOCAB, H)),
        "pos_emb":  w(ks[1], (MAX_POS, H)),
        "type_emb": w(ks[2], (TYPE_VOCAB, H)),
        "emb_ln_g": jnp.ones((H,), jnp.float32),
        "emb_ln_b": jnp.zeros((H,), jnp.float32),
        # kernel operands: matmul weights in bf16 (fast MXU path, half the DMA bytes),
        # biases / LN vectors in f32
        "wqkv": wqkv.astype(bf16), "bqkv": bqkv,
        "wo": wo.astype(bf16),
        "w1": w1.astype(bf16), "b1": jnp.zeros((1, F), jnp.float32),
        "w2": w2.astype(bf16),
        "wp": wp.astype(bf16),
        "wc_pad": wc_pad.astype(bf16),
        "vecs": vecs,
    }


# --- forward (embedding glue in JAX, everything hot in one Pallas call) -------
@jax.jit
def absa_forward(params, input_ids, attention_mask, token_type_ids):
    # embeddings (gathers + layernorm = glue outside the kernel)
    pos_ids = jnp.arange(S)
    emb = (params["word_emb"][input_ids]
           + params["pos_emb"][pos_ids][None, :, :]
           + params["type_emb"][token_type_ids])                           # [B, S, H]
    emb = _layernorm(emb, params["emb_ln_g"], params["emb_ln_b"])
    x = emb.reshape(B * S, H).astype(jnp.float32)                          # flatten for the kernel

    # per-chunk [R, R] additive attention bias: 0 where (same sequence AND key unmasked),
    # -1e9 elsewhere (covers both key padding and cross-sequence pairs). Built in XLA.
    num_chunks = B // CHUNK_B
    chunk_ids = jnp.repeat(jnp.arange(CHUNK_B), S)                         # [R]
    same = (chunk_ids[:, None] == chunk_ids[None, :]).astype(jnp.float32)  # [R, R]
    key_keep = attention_mask.reshape(num_chunks, R).astype(jnp.float32)   # [chunks, R]
    keep = same[None, :, :] * key_keep[:, None, :]                         # [chunks, R, R]
    mask_op = ((1.0 - keep) * NEG).reshape(B * S, R)                       # [B*S, R]

    def const_spec(shape):
        # weights: constant block index -> DMA'd once, VMEM-resident across grid steps
        return pl.BlockSpec(shape, lambda i: (0, 0))

    logits_pad = pl.pallas_call(
        absa_fused_kernel,
        out_shape=jax.ShapeDtypeStruct((B * S, PAD_OUT), jnp.float32),
        grid=(num_chunks,),
        in_specs=[
            pl.BlockSpec((R, H), lambda i: (i, 0)),          # x        (pipelined)
            pl.BlockSpec((R, R), lambda i: (i, 0)),          # mask     (pipelined)
            const_spec((H, 3 * H)),                          # wqkv
            const_spec((1, 3 * H)),                          # bqkv
            const_spec((H, H)),                              # wo
            const_spec((H, F)),                              # w1
            const_spec((1, F)),                              # b1
            const_spec((F, H)),                              # w2
            const_spec((H, H)),                              # wp
            const_spec((H, PAD_OUT)),                        # wc_pad
            const_spec((8, H)),                              # vecs
        ],
        out_specs=pl.BlockSpec((R, PAD_OUT), lambda i: (i, 0)),
        compiler_params=pltpu.CompilerParams(
            dimension_semantics=("parallel",)),              # both TCs on v7x at larger B
    )(x, mask_op, params["wqkv"], params["bqkv"], params["wo"],
      params["w1"], params["b1"], params["w2"], params["wp"],
      params["wc_pad"], params["vecs"])

    # keep only the [CLS] rows and the 3 real classes
    return logits_pad[::S, :NUM_CLASSES]                                   # [B, 3]


if __name__ == "__main__":
    key = jax.random.PRNGKey(0)
    pkey, ikey = jax.random.split(key, 2)
    params = init_params(pkey)

    input_ids = jax.random.randint(ikey, (B, S), 0, VOCAB, dtype=jnp.int32)
    attention_mask = jnp.ones((B, S), jnp.int32).at[1, 6:].set(0).at[3, 5:].set(0)
    token_type_ids = jnp.zeros((B, S), jnp.int32).at[:, 4:].set(1)

    logits = absa_forward(params, input_ids, attention_mask, token_type_ids)
    jax.block_until_ready(logits)
    assert logits.shape == (B, NUM_CLASSES) and logits.dtype == jnp.float32
    print("KERNEL_OK")
</pallas_src>

<mosaic_0001>
module attributes {stable_mosaic.version = 11 : i64} {
  func.func @absa_fused_kernel(%arg0: i32, %arg1: memref<16x128xf32, #tpu.memory_space<vmem>>, %arg2: memref<16x16xf32, #tpu.memory_space<vmem>>, %arg3: memref<128x384xbf16, #tpu.memory_space<vmem>>, %arg4: memref<1x384xf32, #tpu.memory_space<vmem>>, %arg5: memref<128x128xbf16, #tpu.memory_space<vmem>>, %arg6: memref<128x512xbf16, #tpu.memory_space<vmem>>, %arg7: memref<1x512xf32, #tpu.memory_space<vmem>>, %arg8: memref<512x128xbf16, #tpu.memory_space<vmem>>, %arg9: memref<128x128xbf16, #tpu.memory_space<vmem>>, %arg10: memref<128x128xbf16, #tpu.memory_space<vmem>>, %arg11: memref<8x128xf32, #tpu.memory_space<vmem>>, %arg12: memref<16x128xf32, #tpu.memory_space<vmem>>) attributes {dimension_semantics = [#tpu.dimension_semantics<parallel>], iteration_bounds = array<i64: 2>, scalar_prefetch = 0 : i64, scratch_operands = 0 : i64, tpu.core_type = #tpu.core_type<tc>, window_params = [{transform_indices = @transform_0, window_bounds = array<i64: 16, 128>}, {transform_indices = @transform_1, window_bounds = array<i64: 16, 16>}, {pipeline_mode = #tpu.pipeline_mode<synchronous>, transform_indices = @transform_2, window_bounds = array<i64: 128, 384>}, {pipeline_mode = #tpu.pipeline_mode<synchronous>, transform_indices = @transform_3, window_bounds = array<i64: 1, 384>}, {pipeline_mode = #tpu.pipeline_mode<synchronous>, transform_indices = @transform_4, window_bounds = array<i64: 128, 128>}, {pipeline_mode = #tpu.pipeline_mode<synchronous>, transform_indices = @transform_5, window_bounds = array<i64: 128, 512>}, {pipeline_mode = #tpu.pipeline_mode<synchronous>, transform_indices = @transform_6, window_bounds = array<i64: 1, 512>}, {pipeline_mode = #tpu.pipeline_mode<synchronous>, transform_indices = @transform_7, window_bounds = array<i64: 512, 128>}, {pipeline_mode = #tpu.pipeline_mode<synchronous>, transform_indices = @transform_8, window_bounds = array<i64: 128, 128>}, {pipeline_mode = #tpu.pipeline_mode<synchronous>, transform_indices = @transform_9, window_bounds = array<i64: 128, 128>}, {pipeline_mode = #tpu.pipeline_mode<synchronous>, transform_indices = @transform_10, window_bounds = array<i64: 8, 128>}, {transform_indices = @transform_11, window_bounds = array<i64: 16, 128>}]} {
    %c0 = arith.constant 0 : index
    %c0_0 = arith.constant 0 : index
    %0 = vector.load %arg1[%c0, %c0_0] : memref<16x128xf32, #tpu.memory_space<vmem>>, vector<16x128xf32>
    %c0_1 = arith.constant 0 : index
    %c0_2 = arith.constant 0 : index
    %1 = vector.load %arg2[%c0_1, %c0_2] : memref<16x16xf32, #tpu.memory_space<vmem>>, vector<16x16xf32>
    %c0_3 = arith.constant 0 : index
    %c0_4 = arith.constant 0 : index
    %2 = vector.load %arg11[%c0_3, %c0_4] : memref<8x128xf32, #tpu.memory_space<vmem>>, vector<8x128xf32>
    %3 = vector.extract_strided_slice %2 {offsets = [0, 0], sizes = [1, 128], strides = [1, 1]} : vector<8x128xf32> to vector<1x128xf32>
    %4 = vector.extract_strided_slice %2 {offsets = [1, 0], sizes = [1, 128], strides = [1, 1]} : vector<8x128xf32> to vector<1x128xf32>
    %5 = vector.extract_strided_slice %2 {offsets = [2, 0], sizes = [1, 128], strides = [1, 1]} : vector<8x128xf32> to vector<1x128xf32>
    %6 = vector.extract_strided_slice %2 {offsets = [3, 0], sizes = [1, 128], strides = [1, 1]} : vector<8x128xf32> to vector<1x128xf32>
    %7 = vector.extract_strided_slice %2 {offsets = [4, 0], sizes = [1, 128], strides = [1, 1]} : vector<8x128xf32> to vector<1x128xf32>
    %8 = vector.extract_strided_slice %2 {offsets = [5, 0], sizes = [1, 128], strides = [1, 1]} : vector<8x128xf32> to vector<1x128xf32>
    %9 = vector.extract_strided_slice %2 {offsets = [6, 0], sizes = [1, 128], strides = [1, 1]} : vector<8x128xf32> to vector<1x128xf32>
    %10 = vector.extract_strided_slice %2 {offsets = [7, 0], sizes = [1, 128], strides = [1, 1]} : vector<8x128xf32> to vector<1x128xf32>
    %11 = arith.truncf %0 : vector<16x128xf32> to vector<16x128xbf16>
    %c0_5 = arith.constant 0 : index
    %c0_6 = arith.constant 0 : index
    %12 = vector.load %arg3[%c0_5, %c0_6] : memref<128x384xbf16, #tpu.memory_space<vmem>>, vector<128x384xbf16>
    %cst = arith.constant dense<0.000000e+00> : vector<16x384xf32>
    %13 = tpu.matmul %11, %12, %cst {dimension_numbers = #tpu.dot_dimension_numbers<[1], [0], [0], [1], [0, 0, 1, 1], [], []>} : vector<16x128xbf16>, vector<128x384xbf16>, vector<16x384xf32> -> vector<16x384xf32>
    %c0_7 = arith.constant 0 : index
    %c0_8 = arith.constant 0 : index
    %14 = vector.load %arg4[%c0_7, %c0_8] : memref<1x384xf32, #tpu.memory_space<vmem>>, vector<1x384xf32>
    %15 = vector.broadcast %14 : vector<1x384xf32> to vector<16x384xf32>
    %16 = arith.addf %13, %15 : vector<16x384xf32>
    %17 = vector.extract_strided_slice %16 {offsets = [0, 0], sizes = [16, 128], strides = [1, 1]} : vector<16x384xf32> to vector<16x128xf32>
    %18 = arith.truncf %17 : vector<16x128xf32> to vector<16x128xbf16>
    %19 = vector.extract_strided_slice %16 {offsets = [0, 128], sizes = [16, 128], strides = [1, 1]} : vector<16x384xf32> to vector<16x128xf32>
    %20 = arith.truncf %19 : vector<16x128xf32> to vector<16x128xbf16>
    %21 = vector.extract_strided_slice %16 {offsets = [0, 256], sizes = [16, 128], strides = [1, 1]} : vector<16x384xf32> to vector<16x128xf32>
    %22 = arith.truncf %21 : vector<16x128xf32> to vector<16x128xbf16>
    %cst_9 = arith.constant dense<0.000000e+00> : vector<16x16xf32>
    %23 = tpu.matmul %18, %20, %cst_9 {dimension_numbers = #tpu.dot_dimension_numbers<[1], [1], [0], [0], [0, 0, 1, 0], [], []>} : vector<16x128xbf16>, vector<16x128xbf16>, vector<16x16xf32> -> vector<16x16xf32>
    %24 = arith.addf %23, %1 : vector<16x16xf32>
    %cst_10 = arith.constant dense<0xFF800000> : vector<16xf32>
    %25 = vector.multi_reduction <maximumf>, %24, %cst_10 [1] : vector<16x16xf32> to vector<16xf32>
    %26 = vector.shape_cast %25 : vector<16xf32> to vector<16x1xf32>
    %27 = vector.broadcast %26 : vector<16x1xf32> to vector<16x16xf32>
    %28 = arith.subf %24, %27 : vector<16x16xf32>
    %29 = math.exp %28 : vector<16x16xf32>
    %cst_11 = arith.constant dense<0.000000e+00> : vector<16xf32>
    %30 = vector.multi_reduction <add>, %29, %cst_11 [1] : vector<16x16xf32> to vector<16xf32>
    %31 = vector.shape_cast %30 : vector<16xf32> to vector<16x1xf32>
    %32 = tpu.reciprocal %31 {approx = true} : vector<16x1xf32> -> vector<16x1xf32>
    %33 = vector.broadcast %32 : vector<16x1xf32> to vector<16x16xf32>
    %34 = arith.mulf %29, %33 : vector<16x16xf32>
    %35 = arith.truncf %34 : vector<16x16xf32> to vector<16x16xbf16>
    %cst_12 = arith.constant dense<0.000000e+00> : vector<16x128xf32>
    %36 = tpu.matmul %35, %22, %cst_12 {dimension_numbers = #tpu.dot_dimension_numbers<[1], [0], [0], [1], [0, 0, 1, 1], [], []>} : vector<16x16xbf16>, vector<16x128xbf16>, vector<16x128xf32> -> vector<16x128xf32>
    %37 = arith.truncf %36 : vector<16x128xf32> to vector<16x128xbf16>
    %c0_13 = arith.constant 0 : index
    %c0_14 = arith.constant 0 : index
    %38 = vector.load %arg5[%c0_13, %c0_14] : memref<128x128xbf16, #tpu.memory_space<vmem>>, vector<128x128xbf16>
    %cst_15 = arith.constant dense<0.000000e+00> : vector<16x128xf32>
    %39 = tpu.matmul %37, %38, %cst_15 {dimension_numbers = #tpu.dot_dimension_numbers<[1], [0], [0], [1], [0, 0, 1, 1], [], []>} : vector<16x128xbf16>, vector<128x128xbf16>, vector<16x128xf32> -> vector<16x128xf32>
    %40 = vector.broadcast %3 : vector<1x128xf32> to vector<16x128xf32>
    %41 = arith.addf %39, %40 : vector<16x128xf32>
    %42 = arith.addf %0, %41 : vector<16x128xf32>
    %cst_16 = arith.constant dense<0.000000e+00> : vector<16xf32>
    %43 = vector.multi_reduction <add>, %42, %cst_16 [1] : vector<16x128xf32> to vector<16xf32>
    %44 = vector.shape_cast %43 : vector<16xf32> to vector<16x1xf32>
    %cst_17 = arith.constant 1.280000e+02 : f32
    %45 = vector.broadcast %cst_17 : f32 to vector<16x1xf32>
    %46 = arith.divf %44, %45 : vector<16x1xf32>
    %47 = vector.broadcast %46 : vector<16x1xf32> to vector<16x128xf32>
    %48 = arith.subf %42, %47 : vector<16x128xf32>
    %49 = arith.mulf %48, %48 : vector<16x128xf32>
    %cst_18 = arith.constant dense<0.000000e+00> : vector<16xf32>
    %50 = vector.multi_reduction <add>, %49, %cst_18 [1] : vector<16x128xf32> to vector<16xf32>
    %51 = vector.shape_cast %50 : vector<16xf32> to vector<16x1xf32>
    %cst_19 = arith.constant 1.280000e+02 : f32
    %52 = vector.broadcast %cst_19 : f32 to vector<16x1xf32>
    %53 = arith.divf %51, %52 : vector<16x1xf32>
    %54 = vector.broadcast %46 : vector<16x1xf32> to vector<16x128xf32>
    %55 = arith.subf %42, %54 : vector<16x128xf32>
    %cst_20 = arith.constant 9.99999996E-13 : f32
    %56 = vector.broadcast %cst_20 : f32 to vector<16x1xf32>
    %57 = arith.addf %53, %56 : vector<16x1xf32>
    %58 = math.rsqrt %57 : vector<16x1xf32>
    %59 = vector.broadcast %58 : vector<16x1xf32> to vector<16x128xf32>
    %60 = arith.mulf %55, %59 : vector<16x128xf32>
    %61 = vector.broadcast %4 : vector<1x128xf32> to vector<16x128xf32>
    %62 = arith.mulf %60, %61 : vector<16x128xf32>
    %63 = vector.broadcast %5 : vector<1x128xf32> to vector<16x128xf32>
    %64 = arith.addf %62, %63 : vector<16x128xf32>
    %65 = arith.truncf %64 : vector<16x128xf32> to vector<16x128xbf16>
    %c0_21 = arith.constant 0 : index
    %c0_22 = arith.constant 0 : index
    %66 = vector.load %arg6[%c0_21, %c0_22] : memref<128x512xbf16, #tpu.memory_space<vmem>>, vector<128x512xbf16>
    %cst_23 = arith.constant dense<0.000000e+00> : vector<16x512xf32>
    %67 = tpu.matmul %65, %66, %cst_23 {dimension_numbers = #tpu.dot_dimension_numbers<[1], [0], [0], [1], [0, 0, 1, 1], [], []>} : vector<16x128xbf16>, vector<128x512xbf16>, vector<16x512xf32> -> vector<16x512xf32>
    %c0_24 = arith.constant 0 : index
    %c0_25 = arith.constant 0 : index
    %68 = vector.load %arg7[%c0_24, %c0_25] : memref<1x512xf32, #tpu.memory_space<vmem>>, vector<1x512xf32>
    %69 = vector.broadcast %68 : vector<1x512xf32> to vector<16x512xf32>
    %70 = arith.addf %67, %69 : vector<16x512xf32>
    %71 = arith.mulf %70, %70 : vector<16x512xf32>
    %72 = arith.mulf %70, %71 : vector<16x512xf32>
    %cst_26 = arith.constant 4.471500e-02 : f32
    %73 = vector.broadcast %cst_26 : f32 to vector<16x512xf32>
    %74 = arith.mulf %73, %72 : vector<16x512xf32>
    %75 = arith.addf %70, %74 : vector<16x512xf32>
    %cst_27 = arith.constant 0.797884583 : f32
    %76 = vector.broadcast %cst_27 : f32 to vector<16x512xf32>
    %77 = arith.mulf %76, %75 : vector<16x512xf32>
    %78 = math.tanh %77 : vector<16x512xf32>
    %cst_28 = arith.constant 1.000000e+00 : f32
    %79 = vector.broadcast %cst_28 : f32 to vector<16x512xf32>
    %80 = arith.addf %79, %78 : vector<16x512xf32>
    %cst_29 = arith.constant 5.000000e-01 : f32
    %81 = vector.broadcast %cst_29 : f32 to vector<16x512xf32>
    %82 = arith.mulf %81, %80 : vector<16x512xf32>
    %83 = arith.mulf %70, %82 : vector<16x512xf32>
    %84 = arith.truncf %83 : vector<16x512xf32> to vector<16x512xbf16>
    %c0_30 = arith.constant 0 : index
    %c0_31 = arith.constant 0 : index
    %85 = vector.load %arg8[%c0_30, %c0_31] : memref<512x128xbf16, #tpu.memory_space<vmem>>, vector<512x128xbf16>
    %cst_32 = arith.constant dense<0.000000e+00> : vector<16x128xf32>
    %86 = tpu.matmul %84, %85, %cst_32 {dimension_numbers = #tpu.dot_dimension_numbers<[1], [0], [0], [1], [0, 0, 1, 1], [], []>} : vector<16x512xbf16>, vector<512x128xbf16>, vector<16x128xf32> -> vector<16x128xf32>
    %87 = vector.broadcast %6 : vector<1x128xf32> to vector<16x128xf32>
    %88 = arith.addf %86, %87 : vector<16x128xf32>
    %89 = arith.addf %64, %88 : vector<16x128xf32>
    %cst_33 = arith.constant dense<0.000000e+00> : vector<16xf32>
    %90 = vector.multi_reduction <add>, %89, %cst_33 [1] : vector<16x128xf32> to vector<16xf32>
    %91 = vector.shape_cast %90 : vector<16xf32> to vector<16x1xf32>
    %cst_34 = arith.constant 1.280000e+02 : f32
    %92 = vector.broadcast %cst_34 : f32 to vector<16x1xf32>
    %93 = arith.divf %91, %92 : vector<16x1xf32>
    %94 = vector.broadcast %93 : vector<16x1xf32> to vector<16x128xf32>
    %95 = arith.subf %89, %94 : vector<16x128xf32>
    %96 = arith.mulf %95, %95 : vector<16x128xf32>
    %cst_35 = arith.constant dense<0.000000e+00> : vector<16xf32>
    %97 = vector.multi_reduction <add>, %96, %cst_35 [1] : vector<16x128xf32> to vector<16xf32>
    %98 = vector.shape_cast %97 : vector<16xf32> to vector<16x1xf32>
    %cst_36 = arith.constant 1.280000e+02 : f32
    %99 = vector.broadcast %cst_36 : f32 to vector<16x1xf32>
    %100 = arith.divf %98, %99 : vector<16x1xf32>
    %101 = vector.broadcast %93 : vector<16x1xf32> to vector<16x128xf32>
    %102 = arith.subf %89, %101 : vector<16x128xf32>
    %cst_37 = arith.constant 9.99999996E-13 : f32
    %103 = vector.broadcast %cst_37 : f32 to vector<16x1xf32>
    %104 = arith.addf %100, %103 : vector<16x1xf32>
    %105 = math.rsqrt %104 : vector<16x1xf32>
    %106 = vector.broadcast %105 : vector<16x1xf32> to vector<16x128xf32>
    %107 = arith.mulf %102, %106 : vector<16x128xf32>
    %108 = vector.broadcast %7 : vector<1x128xf32> to vector<16x128xf32>
    %109 = arith.mulf %107, %108 : vector<16x128xf32>
    %110 = vector.broadcast %8 : vector<1x128xf32> to vector<16x128xf32>
    %111 = arith.addf %109, %110 : vector<16x128xf32>
    %112 = arith.truncf %111 : vector<16x128xf32> to vector<16x128xbf16>
    %c0_38 = arith.constant 0 : index
    %c0_39 = arith.constant 0 : index
    %113 = vector.load %arg9[%c0_38, %c0_39] : memref<128x128xbf16, #tpu.memory_space<vmem>>, vector<128x128xbf16>
    %cst_40 = arith.constant dense<0.000000e+00> : vector<16x128xf32>
    %114 = tpu.matmul %112, %113, %cst_40 {dimension_numbers = #tpu.dot_dimension_numbers<[1], [0], [0], [1], [0, 0, 1, 1], [], []>} : vector<16x128xbf16>, vector<128x128xbf16>, vector<16x128xf32> -> vector<16x128xf32>
    %115 = vector.broadcast %9 : vector<1x128xf32> to vector<16x128xf32>
    %116 = arith.addf %114, %115 : vector<16x128xf32>
    %117 = math.tanh %116 : vector<16x128xf32>
    %118 = arith.truncf %117 : vector<16x128xf32> to vector<16x128xbf16>
    %c0_41 = arith.constant 0 : index
    %c0_42 = arith.constant 0 : index
    %119 = vector.load %arg10[%c0_41, %c0_42] : memref<128x128xbf16, #tpu.memory_space<vmem>>, vector<128x128xbf16>
    %cst_43 = arith.constant dense<0.000000e+00> : vector<16x128xf32>
    %120 = tpu.matmul %118, %119, %cst_43 {dimension_numbers = #tpu.dot_dimension_numbers<[1], [0], [0], [1], [0, 0, 1, 1], [], []>} : vector<16x128xbf16>, vector<128x128xbf16>, vector<16x128xf32> -> vector<16x128xf32>
    %121 = vector.broadcast %10 : vector<1x128xf32> to vector<16x128xf32>
    %122 = arith.addf %120, %121 : vector<16x128xf32>
    %c0_44 = arith.constant 0 : index
    %c0_45 = arith.constant 0 : index
    %123 = vector.load %arg12[%c0_44, %c0_45] : memref<16x128xf32, #tpu.memory_space<vmem>>, vector<16x128xf32>
    tpu.vector_store %arg12[%c0_44, %c0_45], %122 {strides = array<i32>} : memref<16x128xf32, #tpu.memory_space<vmem>>, vector<16x128xf32>,
    return
  }
  func.func @transform_0(%arg0: i32) -> (i32, i32) {
    %c0_i32 = arith.constant 0 : i32
    %c0_i32_0 = arith.constant 0 : i32
    return %arg0, %c0_i32 : i32, i32
  }
  func.func @transform_1(%arg0: i32) -> (i32, i32) {
    %c0_i32 = arith.constant 0 : i32
    %c0_i32_0 = arith.constant 0 : i32
    return %arg0, %c0_i32 : i32, i32
  }
  func.func @transform_2(%arg0: i32) -> (i32, i32) {
    %c0_i32 = arith.constant 0 : i32
    %c0_i32_0 = arith.constant 0 : i32
    %c0_i32_1 = arith.constant 0 : i32
    return %c0_i32, %c0_i32_0 : i32, i32
  }
  func.func @transform_3(%arg0: i32) -> (i32, i32) {
    %c0_i32 = arith.constant 0 : i32
    %c0_i32_0 = arith.constant 0 : i32
    %c0_i32_1 = arith.constant 0 : i32
    return %c0_i32, %c0_i32_0 : i32, i32
  }
  func.func @transform_4(%arg0: i32) -> (i32, i32) {
    %c0_i32 = arith.constant 0 : i32
    %c0_i32_0 = arith.constant 0 : i32
    %c0_i32_1 = arith.constant 0 : i32
    return %c0_i32, %c0_i32_0 : i32, i32
  }
  func.func @transform_5(%arg0: i32) -> (i32, i32) {
    %c0_i32 = arith.constant 0 : i32
    %c0_i32_0 = arith.constant 0 : i32
    %c0_i32_1 = arith.constant 0 : i32
    return %c0_i32, %c0_i32_0 : i32, i32
  }
  func.func @transform_6(%arg0: i32) -> (i32, i32) {
    %c0_i32 = arith.constant 0 : i32
    %c0_i32_0 = arith.constant 0 : i32
    %c0_i32_1 = arith.constant 0 : i32
    return %c0_i32, %c0_i32_0 : i32, i32
  }
  func.func @transform_7(%arg0: i32) -> (i32, i32) {
    %c0_i32 = arith.constant 0 : i32
    %c0_i32_0 = arith.constant 0 : i32
    %c0_i32_1 = arith.constant 0 : i32
    return %c0_i32, %c0_i32_0 : i32, i32
  }
  func.func @transform_8(%arg0: i32) -> (i32, i32) {
    %c0_i32 = arith.constant 0 : i32
    %c0_i32_0 = arith.constant 0 : i32
    %c0_i32_1 = arith.constant 0 : i32
    return %c0_i32, %c0_i32_0 : i32, i32
  }
  func.func @transform_9(%arg0: i32) -> (i32, i32) {
    %c0_i32 = arith.constant 0 : i32
    %c0_i32_0 = arith.constant 0 : i32
    %c0_i32_1 = arith.constant 0 : i32
    return %c0_i32, %c0_i32_0 : i32, i32
  }
  func.func @transform_10(%arg0: i32) -> (i32, i32) {
    %c0_i32 = arith.constant 0 : i32
    %c0_i32_0 = arith.constant 0 : i32
    %c0_i32_1 = arith.constant 0 : i32
    return %c0_i32, %c0_i32_0 : i32, i32
  }
  func.func @transform_11(%arg0: i32) -> (i32, i32) {
    %c0_i32 = arith.constant 0 : i32
    %c0_i32_0 = arith.constant 0 : i32
    return %arg0, %c0_i32 : i32, i32
  }
}

</mosaic_0001>

<bundles_post_ra>
// kernel: absa_forward.1
= control target key start
LH: loop header
LB: loop body
LE: loop exit
PB: predicated region body
PF: predicated region fallthrough
CT: control target
= control target key end

     0   :  { %s2440_s17 = smov 0   ;;  %s3089_s0 = inlined_call_operand.vmem [shape: f32[32,128], index: 0, kind: input, shape index: {}]   ;;  %s3090_s1 = inlined_call_operand.vmem [shape: f32[32,16], index: 1, kind: input, shape index: {}]   ;;  %s3091_s2 = inlined_call_operand.vmem [shape: bf16[128,384], index: 2, kind: input, shape index: {}]   ;;  %s3092_s3 = inlined_call_operand.vmem [shape: f32[1,384], index: 3, kind: input, shape index: {}]   ;;  %s3093_s4 = inlined_call_operand.vmem [shape: bf16[128,128], index: 4, kind: input, shape index: {}]   ;;  %s3094_s5 = inlined_call_operand.vmem [shape: bf16[128,512], index: 5, kind: input, shape index: {}]   ;;  %s3095_s6 = inlined_call_operand.vmem [shape: f32[1,512], index: 6, kind: input, shape index: {}]   ;;  %s3096_s7 = inlined_call_operand.vmem [shape: bf16[512,128], index: 7, kind: input, shape index: {}]   ;;  %s3097_s8 = inlined_call_operand.vmem [shape: bf16[128,128], index: 8, kind: input, shape index: {}]   ;;  %s3098_s9 = inlined_call_operand.vmem [shape: bf16[128,128], index: 9, kind: input, shape index: {}]   ;;  %s3099_s10 = inlined_call_operand.vmem [shape: f32[8,128], index: 10, kind: input, shape index: {}]   ;;  %s3100_s11 = inlined_call_operand.vmem [shape: f32[32,128], index: 11, kind: output, shape index: {}]  }
   0x1 LB: > { %s1750_s18 = sadd.s32 4294967295, %s2377_s17   ;;  %p1754_p0 = scmp.ge.s32.totalorder %s2377_s17, 1  ;;  %s2377_s17 = sphi %s2440_s17, %s21_s17  }
   0x2   : > { %p349_p1 = scmp.lt.s32.totalorder %s2377_s17, 3 }
   0x4   : > { %p350_p2 = pnand %p1754_p0, %p349_p1 }
   0x5   : > { %s1755_s15 = sshll.u32 (!%p350_p2), %s1750_s18, 1 }
   0x6   : > { %353 = sbr.rel (%p350_p2) target bundleno = 2007 (0x7d7), region = 64  ;;  %p395_p3 = scmp.lt.s32.totalorder (!%p350_p2), %s1755_s15, 3 }
   0xb   : > { %v1847_v0 = vld [vmem:[%s3091_s2 + $0xa8] sm:$0xf]  ;;  %v2234_v1 = vld [vmem:[%s3091_s2 + $0xb0] sm:$0xf0]  ;;  %v2233_v2 = vld [vmem:[%s3091_s2 + $0xac] sm:$0xf] }
   0xc   : > { %v1848_v3 = vor.u32 %v2234_v1, %v1847_v0  ;;  %v1849_v4 = vld [vmem:[%s3091_s2 + $0xb4] sm:$0xf0]  ;;  %v1835_v5 = vld [vmem:[%s3091_s2 + $0x90] sm:$0xf]  ;;  %v2231_v6 = vld [vmem:[%s3091_s2 + $0x98] sm:$0xf0] }
   0xd   : > { %v1852_v7 = vor.u32 %v2233_v2, %v1849_v4  ;;  %v2230_v8 = vld [vmem:[%s3091_s2 + $0x94] sm:$0xf]  ;;  %v1837_v9 = vld [vmem:[%s3091_s2 + $0x9c] sm:$0xf0]  ;;  %v1836_v10 = vor.u32 %v2231_v6, %v1835_v5  ;;  %v1823_v12 = vld [vmem:[%s3091_s2 + $0x78] sm:$0xf] }
   0xe   : > { %587 = vmatpush.bf16.msra.mxu0 %v1848_v3  ;;  %v1840_v11 = vor.u32 %v2230_v8, %v1837_v9  ;;  %v2228_v13 = vld [vmem:[%s3091_s2 + $0x80] sm:$0xf0]  ;;  %v2227_v14 = vld [vmem:[%s3091_s2 + $0x7c] sm:$0xf]  ;;  %v1825_v15 = vld [vmem:[%s3091_s2 + $0x84] sm:$0xf0] }
   0xf   : > { %601 = vmatpush.bf16.msra.mxu1 %v1852_v7  ;;  %v1824_v16 = vor.u32 %v2228_v13, %v1823_v12  ;;  %v1828_v17 = vor.u32 %v2227_v14, %v1825_v15  ;;  %v1811_v18 = vld [vmem:[%s3091_s2 + $0x60] sm:$0xf]  ;;  %v2225_v19 = vld [vmem:[%s3091_s2 + $0x68] sm:$0xf0]  ;;  %v2224_v20 = vld [vmem:[%s3091_s2 + $0x64] sm:$0xf] }
  0x10   : > { %v1813_v21 = vld [vmem:[%s3091_s2 + $0x6c] sm:$0xf0]  ;;  %v1812_v22 = vor.u32 %v2225_v19, %v1811_v18  ;;  %v1799_v24 = vld [vmem:[%s3091_s2 + $0x48] sm:$0xf]  ;;  %v2222_v25 = vld [vmem:[%s3091_s2 + $0x50] sm:$0xf0] }
  0x11   : > { %v1816_v23 = vor.u32 %v2224_v20, %v1813_v21  ;;  %v2221_v26 = vld [vmem:[%s3091_s2 + $0x4c] sm:$0xf]  ;;  %v1801_v27 = vld [vmem:[%s3091_s2 + $0x54] sm:$0xf0]  ;;  %v1800_v28 = vor.u32 %v2222_v25, %v1799_v24  ;;  %v1787_v30 = vld [vmem:[%s3091_s2 + $0x30] sm:$0xf] }
  0x12   : > { %588 = vmatpush.bf16.msra.mxu0 %v1836_v10  ;;  %v1804_v29 = vor.u32 %v2221_v26, %v1801_v27  ;;  %v2219_v31 = vld [vmem:[%s3091_s2 + $0x38] sm:$0xf0]  ;;  %v2218_v32 = vld [vmem:[%s3091_s2 + $0x34] sm:$0xf]  ;;  %v1789_v33 = vld [vmem:[%s3091_s2 + $0x3c] sm:$0xf0] }
  0x13   : > { %602 = vmatpush.bf16.msra.mxu1 %v1840_v11  ;;  %s3102_s15 = smov (!%p395_p3, %s1755_s15), 3  ;;  %v1788_v34 = vor.u32 %v2219_v31, %v1787_v30  ;;  %v1792_v35 = vor.u32 %v2218_v32, %v1789_v33  ;;  %v1775_v36 = vld [vmem:[%s3091_s2 + $0x18] sm:$0xf]  ;;  %v2216_v37 = vld [vmem:[%s3091_s2 + $0x20] sm:$0xf0]  ;;  %vm646_vm0 = vcmask 130048  }
  0x14   : > { %v2215_v38 = vld [vmem:[%s3091_s2 + $0x1c] sm:$0xf]  ;;  %v1777_v39 = vld [vmem:[%s3091_s2 + $0x24] sm:$0xf0]  ;;  %s2534_s25 = sshll.u32 %s3102_s15, 3  ;;  %v1776_v40 = vor.u32 %v2216_v37, %v1775_v36 }
  0x15   : > { %v1780_v41 = vor.u32 %v2215_v38, %v1777_v39  ;;  %v1763_v42 = vld [vmem:[%s3091_s2] sm:$0xf]  ;;  %v2213_v43 = vld [vmem:[%s3091_s2 + $0x8] sm:$0xf0]  ;;  %s398_s12 = scalar_lea.vmem %s3089_s0, %s2534_s25  ;;  %v2212_v44 = vld [vmem:[%s3091_s2 + $0x4] sm:$0xf]  ;;  %s404_s26 = scalar_lea.vmem %s3090_s1, %s2534_s25 }
  0x16   : > { %589 = vmatpush.bf16.msra.mxu0 %v1824_v16  ;;  %v1765_v45 = vld [vmem:[%s3091_s2 + $0xc] sm:$0xf0]  ;;  %v1764_v46 = vor.u32 %v2213_v43, %v1763_v42  ;;  %v2552_v47 = vld [vmem:[%s398_s12] sm:$0xff]  ;;  %v2554_v48 = vld [vmem:[%s398_s12 + $0x8] sm:$0xff]  ;;  %s410_s30 = scalar_lea.vmem %s3100_s11, %s2534_s25 }
  0x17   : > { %603 = vmatpush.bf16.msra.mxu1 %v1828_v17  ;;  %v1768_v49 = vor.u32 %v2212_v44, %v1765_v45  ;;  %v2558_v50 = vpack.c.bf16 %v2554_v48, %v2552_v47  ;;  %v2565_v53 = vld [vmem:[%s3092_s3] sm:$0x7]  ;;  %v1855_v0 = vld [vmem:[%s3091_s2 + $0xb0] sm:$0xf]  ;;  %v2235_v1 = vld [vmem:[%s3091_s2 + $0xb8] sm:$0xf0] }
  0x18   : > { %v454_v54 = vperm.slane %v2565_v53, 1  ;;  %v453_v58 = vperm.slane %v2565_v53, 0  ;;  %v1843_v2 = vld [vmem:[%s3091_s2 + $0x98] sm:$0xf]  ;;  %v1856_v3 = vor.u32 %v2235_v1, %v1855_v0  ;;  %v2232_v4 = vld [vmem:[%s3091_s2 + $0xa0] sm:$0xf0] }
  0x19   : > { %v1844_v5 = vor.u32 %v2232_v4, %v1843_v2  ;;  %v1831_v6 = vld [vmem:[%s3091_s2 + $0x80] sm:$0xf]  ;;  %v2229_v7 = vld [vmem:[%s3091_s2 + $0x88] sm:$0xf0]  ;;  %v1819_v9 = vld [vmem:[%s3091_s2 + $0x68] sm:$0xf] }
  0x1a   : > { %590 = vmatpush.bf16.msra.mxu0 %v1812_v22  ;;  %615 = vmatpush.bf16.msra.mxu2 %v1856_v3  ;;  %v1832_v8 = vor.u32 %v2229_v7, %v1831_v6  ;;  %v2226_v10 = vld [vmem:[%s3091_s2 + $0x70] sm:$0xf0]  ;;  %v1807_v12 = vld [vmem:[%s3091_s2 + $0x50] sm:$0xf]  ;;  %v2223_v13 = vld [vmem:[%s3091_s2 + $0x58] sm:$0xf0] }
  0x1b   : > { %604 = vmatpush.bf16.msra.mxu1 %v1816_v23  ;;  %v1820_v11 = vor.u32 %v2226_v10, %v1819_v9  ;;  %v1808_v14 = vor.u32 %v2223_v13, %v1807_v12  ;;  %v1795_v15 = vld [vmem:[%s3091_s2 + $0x38] sm:$0xf]  ;;  %v2220_v16 = vld [vmem:[%s3091_s2 + $0x40] sm:$0xf0]  ;;  %v1783_v20 = vld [vmem:[%s3091_s2 + $0x20] sm:$0xf] }
  0x1c   : > { %v415_v17 = vld [vmem:[%s404_s26] sm:$0xff]  ;;  %v1796_v18 = vor.u32 %v2220_v16, %v1795_v15  ;;  %v2217_v21 = vld [vmem:[%s3091_s2 + $0x28] sm:$0xf0]  ;;  %v1771_v25 = vld [vmem:[%s3091_s2 + $0x8] sm:$0xf]  ;;  %v455_v43 = vperm.slane %v2565_v53, 2 }
  0x1d   : > { %v1784_v24 = vor.u32 %v2217_v21, %v1783_v20  ;;  %v2214_v26 = vld [vmem:[%s3091_s2 + $0x10] sm:$0xf0]  ;;  %v416_v27 = vld [vmem:[%s404_s26 + $0x8] sm:$0xff]  ;;  %v2240_v53 = vld [vmem:[%s3093_s4 + $0x20] sm:$0xff]  ;;  %v2379_v12 = vmov 128.0  }
  0x1e   : > { %591 = vmatpush.bf16.msra.mxu0 %v1800_v28  ;;  %616 = vmatpush.bf16.msra.mxu2 %v1844_v5  ;;  %v1772_v28 = vor.u32 %v2214_v26, %v1771_v25  ;;  %v2236_v0 = vld [vmem:[%s3093_s4] sm:$0xff]  ;;  %v2274_v26 = vld [vmem:[%s3094_s5 + $0xec] sm:$0xf0] }
  0x1f   : > { %605 = vmatpush.bf16.msra.mxu1 %v1804_v29  ;;  %v2655_v4 = vld [vmem:[%s3099_s10] sm:$0xff] }
  0x20   : > { %v704_v5 = vperm.slane %v2655_v4, 0  ;;  %v2004_v25 = vld [vmem:[%s3094_s5 + $0xe0] sm:$0xf] }
  0x22   : > { %592 = vmatpush.bf16.msra.mxu0 %v1788_v34  ;;  %617 = vmatpush.bf16.msra.mxu2 %v1832_v8 }
  0x23   : > { %606 = vmatpush.bf16.msra.mxu1 %v1792_v35 }
  0x26   : > { %593 = vmatpush.bf16.msra.mxu0 %v1776_v40  ;;  %618 = vmatpush.bf16.msra.mxu2 %v1820_v11 }
  0x27   : > { %607 = vmatpush.bf16.msra.mxu1 %v1780_v41 }
  0x2a   : > { %594 = vmatpush.bf16.msra.mxu0 %v1764_v46  ;;  %619 = vmatpush.bf16.msra.mxu2 %v1808_v14 }
  0x2b   : > { %608 = vmatpush.bf16.msra.mxu1 %v1768_v49 }
  0x2d   : > { %595 = vmatmul.bf16.vlgmr.msra.gmra.mxu0 %v2558_v50 }
  0x2e   : > { %609 = vmatmul.bf16.vlgmr.msra.gmra.mxu1 %v2558_v50  ;;  %620 = vmatpush.bf16.msra.mxu2 %v1796_v18 }
  0x32   : > { %621 = vmatpush.bf16.msra.mxu2 %v1784_v24 }
  0x36   : > { %622 = vmatpush.bf16.msra.mxu2 %v1772_v28  ;;  %v2005_v28 = vor.u32 %v2274_v26, %v2004_v25  ;;  %v1924_v25 = vld [vmem:[%s3094_s5 + $0x40] sm:$0xf]  ;;  %v2254_v26 = vld [vmem:[%s3094_s5 + $0x4c] sm:$0xf0] }
  0x38   : > { %1025 = vmatpush.bf16.msrb.mxu0 %v2005_v28  ;;  %v1925_v28 = vor.u32 %v2254_v26, %v1924_v25  ;;  %v819_v25 = vperm.slane %v2655_v4, 2 }
  0x39   : > { %623 = vmatmul.bf16.vlgmr.msra.gmra.mxu2 %v2558_v50  ;;  %v2243_v50 = vld [vmem:[%s3093_s4 + $0x38] sm:$0xff] }
  0xaa   : > { %v596_v52 = vpop.f32.mrf.mxu0 }
  0xab   : > { %v610_v51 = vpop.f32.mrf.mxu1  ;;  %v597_v61 = vadd.f32 %v596_v52, %v453_v58  ;;  %v2241_v52 = vld [vmem:[%s3093_s4 + $0x28] sm:$0xff] }
  0xac   : > { %v611_v56 = vadd.f32 %v610_v51, %v454_v54  ;;  %v2242_v51 = vld [vmem:[%s3093_s4 + $0x30] sm:$0xff] }
  0xb2   : > { %v598_v59 = vpop.f32.mrf.mxu0 }
  0xb3   : > { %v612_v55 = vpop.f32.mrf.mxu1  ;;  %v599_v62 = vadd.f32 %v598_v59, %v453_v58 }
  0xb4   : > { %v613_v57 = vadd.f32 %v612_v55, %v454_v54  ;;  %v2239_v55 = vld [vmem:[%s3093_s4 + $0x18] sm:$0xff] }
  0xb5   : > { %v629_v63 = vpack.c.bf16 %v599_v62, %v597_v61  ;;  %v2238_v62 = vld [vmem:[%s3093_s4 + $0x10] sm:$0xff] }
  0xb6   : > { %v630_v60 = vpack.c.bf16 %v613_v57, %v611_v56 }
  0xb8   : > { %639 = vmatpush.bf16.xpose.msra.mxu3 %v630_v60 }
  0xbc   : > { %v624_v42 = vpop.f32.mrf.mxu2 }
  0xbd   : > { %v625_v44 = vadd.f32 %v624_v42, %v455_v43  ;;  %v1996_v42 = vld [vmem:[%s3094_s5 + $0xc8] sm:$0xf] }
  0xbf   : > { %640 = vmatmul.bf16.vlgmr.msra.gmra.mxu3 %v629_v63  ;;  %v2237_v63 = vld [vmem:[%s3093_s4 + $0x8] sm:$0xff] }
  0xc4   : > { %v626_v45 = vpop.f32.mrf.mxu2 }
  0xc5   : > { %v627_v46 = vadd.f32 %v626_v45, %v455_v43  ;;  %v2271_v43 = vld [vmem:[%s3094_s5 + $0xd4] sm:$0xf0] }
  0xc6   : > { %v1997_v45 = vor.u32 %v2271_v43, %v1996_v42  ;;  %v1916_v42 = vld [vmem:[%s3094_s5 + $0x28] sm:$0xf]  ;;  %v2251_v43 = vld [vmem:[%s3094_s5 + $0x34] sm:$0xf0] }
  0xc7   : > { %v631_v49 = vpack.c.bf16 %v627_v46, %v625_v44  ;;  %v2269_v46 = vld [vmem:[%s3094_s5 + $0xcc] sm:$0xf] }
  0xc9   : > { %680 = vmatpush.bf16.msrb.mxu3 %v631_v49  ;;  %v1998_v49 = vld [vmem:[%s3094_s5 + $0xd8] sm:$0xf0] }
  0xcd   : > { %753 = vmatpush.bf16.msra.mxu3 %v2243_v50  ;;  %v2001_v50 = vor.u32 %v2269_v46, %v1998_v49  ;;  %v2249_v46 = vld [vmem:[%s3094_s5 + $0x2c] sm:$0xf]  ;;  %v1918_v49 = vld [vmem:[%s3094_s5 + $0x38] sm:$0xf0] }
  0xd1   : > { %754 = vmatpush.bf16.msra.mxu3 %v2242_v51  ;;  %v1972_v51 = vld [vmem:[%s3094_s5 + $0xa0] sm:$0xf] }
  0xd5   : > { %755 = vmatpush.bf16.msra.mxu3 %v2241_v52  ;;  %v2266_v52 = vld [vmem:[%s3094_s5 + $0xac] sm:$0xf0] }
  0xd9   : > { %756 = vmatpush.bf16.msra.mxu3 %v2240_v53  ;;  %v2264_v53 = vld [vmem:[%s3094_s5 + $0xa4] sm:$0xf] }
  0xdd   : > { %757 = vmatpush.bf16.msra.mxu3 %v2239_v55  ;;  %v1974_v55 = vld [vmem:[%s3094_s5 + $0xb0] sm:$0xf0] }
  0xe1   : > { %758 = vmatpush.bf16.msra.mxu3 %v2238_v62 }
  0xe5   : > { %759 = vmatpush.bf16.msra.mxu3 %v2237_v63  ;;  %v1956_v63 = vld [vmem:[%s3094_s5 + $0x80] sm:$0xf] }
  0xe9   : > { %760 = vmatpush.bf16.msra.mxu3 %v2236_v0  ;;  %v2262_v0 = vld [vmem:[%s3094_s5 + $0x8c] sm:$0xf0] }
 0x142   : > { %v641_v19 = vpop.f32.mrf.mxu3 }
 0x143   : > { %v642_v22 = vadd.f32 %v641_v19, %v415_v17 }
 0x145   : > { %v647_v23 = vsel %vm646_vm0, %v642_v22, -inf }
 0x146   : > { %648 = vmax.xlane.f32.xlu0 %v647_v23 }
 0x14a   : > { %v643_v29 = vpop.f32.mrf.mxu3 }
 0x14b   : > { %v644_v30 = vadd.f32 %v643_v29, %v416_v27  ;;  %v2272_v27 = vld [vmem:[%s3094_s5 + $0xe4] sm:$0xf]  ;;  %v2006_v29 = vld [vmem:[%s3094_s5 + $0xf0] sm:$0xf0] }
 0x14d   : > { %v650_v31 = vsel %vm646_vm0, %v644_v30, -inf }
 0x14e   : > { %651 = vmax.xlane.f32.xlu0 %v650_v31  ;;  %v2275_v31 = vld [vmem:[%s3094_s5 + $0xf4] sm:$0xf0] }
 0x1b9   : > { %v649_v32 = vpop.xlane.xlu0 %648 }
 0x1ba   : > { %v653_v33 = vsub.f32 %v642_v22, %v649_v32  ;;  %v2009_v32 = vor.u32 %v2272_v27, %v2006_v29  ;;  %v2252_v27 = vld [vmem:[%s3094_s5 + $0x44] sm:$0xf]  ;;  %v1926_v29 = vld [vmem:[%s3094_s5 + $0x50] sm:$0xf0] }
 0x1bc   : > { %v655_v34 = vmul.f32 1.442695, %v653_v33  ;;  %1039 = vmatpush.bf16.msrb.mxu1 %v2009_v32  ;;  %v1929_v32 = vor.u32 %v2252_v27, %v1926_v29 }
 0x1be   : > { %2333 = vpow2.f32 %v655_v34  ;;  %v2273_v34 = vld [vmem:[%s3094_s5 + $0xec] sm:$0xf] }
 0x1c1   : > { %v652_v35 = vpop.xlane.xlu0 %651 }
 0x1c2   : > { %v654_v36 = vsub.f32 %v644_v30, %v652_v35  ;;  %v2012_v30 = vld [vmem:[%s3094_s5 + $0xe8] sm:$0xf]  ;;  %v2014_v35 = vld [vmem:[%s3094_s5 + $0xf8] sm:$0xf0] }
 0x1c3   : > { %v2013_v33 = vor.u32 %v2275_v31, %v2012_v30  ;;  %v1932_v30 = vld [vmem:[%s3094_s5 + $0x48] sm:$0xf]  ;;  %v2255_v31 = vld [vmem:[%s3094_s5 + $0x54] sm:$0xf0] }
 0x1c4   : > { %v2334_v37 = vpop.eup %2333  ;;  %v657_v38 = vmul.f32 1.442695, %v654_v36  ;;  %v2017_v36 = vor.u32 %v2273_v34, %v2014_v35  ;;  %v2253_v34 = vld [vmem:[%s3094_s5 + $0x4c] sm:$0xf]  ;;  %v1934_v35 = vld [vmem:[%s3094_s5 + $0x58] sm:$0xf0] }
 0x1c5   : > { %v659_v39 = vsel %vm646_vm0, %v2334_v37, 0.0  ;;  %1053 = vmatpush.bf16.msrb.mxu2 %v2013_v33  ;;  %v1933_v33 = vor.u32 %v2255_v31, %v1932_v30  ;;  %v2282_v30 = vld [vmem:[%s3096_s7 + $0x30] sm:$0xff] }
 0x1c6   : > { %2335 = vpow2.f32 %v657_v38  ;;  %660 = vadd.xlane.f32.xlu1 %v659_v39  ;;  %v2270_v38 = vld [vmem:[%s3094_s5 + $0xcc] sm:$0xf0]  ;;  %v2268_v39 = vld [vmem:[%s3094_s5 + $0xc4] sm:$0xf] }
 0x1c7   : > { %v2290_v31 = vld [vmem:[%s3096_s7 + $0x70] sm:$0xff] }
 0x1c9   : > { %1054 = vmatpush.bf16.msrb.mxu2 %v1997_v45  ;;  %v1917_v45 = vor.u32 %v2251_v43, %v1916_v42  ;;  %v2279_v42 = vld [vmem:[%s3096_s7 + $0x18] sm:$0xff] }
 0x1ca   : > { %v2287_v43 = vld [vmem:[%s3096_s7 + $0x58] sm:$0xff] }
 0x1cc   : > { %v2336_v40 = vpop.eup %2335 }
 0x1cd   : > { %v662_v41 = vsel %vm646_vm0, %v2336_v40, 0.0 }
 0x1ce   : > { %663 = vadd.xlane.f32.xlu1 %v662_v41  ;;  %v1990_v41 = vld [vmem:[%s3094_s5 + $0xd0] sm:$0xf0] }
 0x1cf   : > { %v1993_v44 = vor.u32 %v2268_v39, %v1990_v41  ;;  %v2248_v39 = vld [vmem:[%s3094_s5 + $0x24] sm:$0xf]  ;;  %v1910_v41 = vld [vmem:[%s3094_s5 + $0x30] sm:$0xf0] }
 0x1d1   : > { %1040 = vmatpush.bf16.msrb.mxu1 %v1993_v44  ;;  %v1913_v44 = vor.u32 %v2248_v39, %v1910_v41  ;;  %v2288_v39 = vld [vmem:[%s3096_s7 + $0x60] sm:$0xff]  ;;  %v2305_v41 = vld [vmem:[%s3096_s7 + $0xe8] sm:$0xff] }
 0x239   : > { %v661_v54 = vpop.xlane.xlu1 %660 }
 0x23a   : > { %2337 = vrcp.f32 %v661_v54  ;;  %v1973_v54 = vor.u32 %v2266_v52, %v1972_v51  ;;  %v1921_v52 = vor.u32 %v2249_v46, %v1918_v49  ;;  %v2278_v46 = vld [vmem:[%s3096_s7 + $0x10] sm:$0xff] }
 0x23b   : > { %v2286_v49 = vld [vmem:[%s3096_s7 + $0x50] sm:$0xff] }
 0x240   : > { %v2338_v57 = vpop.eup %2337 }
 0x241   : > { %v664_v56 = vpop.xlane.xlu1 %663  ;;  %v667_v59 = vmul.f32 %v2338_v57, %v2334_v37  ;;  %v1988_v37 = vld [vmem:[%s3094_s5 + $0xc0] sm:$0xf]  ;;  %v2267_v57 = vld [vmem:[%s3094_s5 + $0xb4] sm:$0xf0] }
 0x242   : > { %2339 = vrcp.f32 %v664_v56  ;;  %v1980_v56 = vld [vmem:[%s3094_s5 + $0xa8] sm:$0xf] }
 0x243   : > { %2341 = vrcp.f32 %v2379_v12  ;;  %v1940_v12 = vld [vmem:[%s3094_s5 + $0x60] sm:$0xf] }
 0x248   : > { %v2340_v58 = vpop.eup %2339 }
 0x249   : > { %v668_v60 = vmul.f32 %v2340_v58, %v2336_v40  ;;  %v2342_v13 = vpop.eup %2341  ;;  %v1989_v40 = vor.u32 %v2270_v38, %v1988_v37  ;;  %v1977_v58 = vor.u32 %v2264_v53, %v1974_v55  ;;  %v1908_v37 = vld [vmem:[%s3094_s5 + $0x20] sm:$0xf]  ;;  %v2250_v38 = vld [vmem:[%s3094_s5 + $0x2c] sm:$0xf0]  ;;  %v1894_v55 = vld [vmem:[%s3094_s5 + $0x10] sm:$0xf0] }
 0x24a   : > { %v774_v14 = vmul.f32 128.0, %v2342_v13  ;;  %vm778_vm1 = vweird.f32 %v2342_v13  ;;  %v2246_v53 = vld [vmem:[%s3094_s5 + $0xc] sm:$0xf0] }
 0x24b   : > { %v669_v61 = vpack.c.bf16 %v668_v60, %v667_v59  ;;  %1026 = vmatpush.bf16.msrb.mxu0 %v1989_v40  ;;  %v1981_v59 = vor.u32 %v2267_v57, %v1980_v56  ;;  %v2265_v60 = vld [vmem:[%s3094_s5 + $0xac] sm:$0xf]  ;;  %1041 = vmatpush.bf16.msrb.mxu1 %v1977_v58  ;;  %v1909_v40 = vor.u32 %v2250_v38, %v1908_v37  ;;  %v2306_v37 = vld [vmem:[%s3096_s7 + $0xf0] sm:$0xff]  ;;  %v2280_v38 = vld [vmem:[%s3096_s7 + $0x20] sm:$0xff] }
 0x24c   : > { %v775_v15 = vsub.f32 1.0, %v774_v14  ;;  %v2256_v14 = vld [vmem:[%s3094_s5 + $0x64] sm:$0xf] }
 0x24d   : > { %1857 = vmatmul.msk.bf16.vlgmr.msrb.gmra.mxu3 %vm646_vm0, %v669_v61  ;;  %v1982_v61 = vld [vmem:[%s3094_s5 + $0xb8] sm:$0xf0]  ;;  %1055 = vmatpush.bf16.msrb.mxu2 %v1981_v59  ;;  %v1900_v59 = vld [vmem:[%s3094_s5 + $0x8] sm:$0xf] }
 0x24e   : > { %v776_v16 = vmul.f32 %v2342_v13, %v775_v15  ;;  %1067 = vmatpush.bf16.msrb.mxu3 %v2017_v36  ;;  %v1985_v62 = vor.u32 %v2265_v60, %v1982_v61  ;;  %v1937_v36 = vor.u32 %v2253_v34, %v1934_v35  ;;  %v2247_v60 = vld [vmem:[%s3094_s5 + $0x14] sm:$0xf0]  ;;  %v2245_v61 = vld [vmem:[%s3094_s5 + $0xc] sm:$0xf] }
 0x24f   : > { %1027 = vmatpush.bf16.msrb.mxu0 %v1973_v54  ;;  %v2244_v54 = vld [vmem:[%s3094_s5 + $0x4] sm:$0xf]  ;;  %v2281_v34 = vld [vmem:[%s3096_s7 + $0x28] sm:$0xff] }
 0x250   : > { %v777_v17 = vadd.f32 %v2342_v13, %v776_v16  ;;  %v1942_v16 = vld [vmem:[%s3094_s5 + $0x70] sm:$0xf0]  ;;  %v1897_v58 = vor.u32 %v2244_v54, %v1894_v55  ;;  %v2289_v35 = vld [vmem:[%s3096_s7 + $0x68] sm:$0xff] }
 0x251   : > { %v2277_v55 = vld [vmem:[%s3096_s7 + $0x8] sm:$0xff] }
 0x252   : > { %v2660_v18 = vsel %vm778_vm1, %v2342_v13, %v777_v17  ;;  %1068 = vmatpush.bf16.msrb.mxu3 %v2001_v50  ;;  %v2258_v13 = vld [vmem:[%s3094_s5 + $0x6c] sm:$0xf0]  ;;  %v1948_v17 = vld [vmem:[%s3094_s5 + $0x68] sm:$0xf]  ;;  %v1892_v50 = vld [vmem:[%s3094_s5] sm:$0xf] }
 0x253   : > { %v1941_v15 = vor.u32 %v2258_v13, %v1940_v12  ;;  %v1893_v57 = vor.u32 %v2246_v53, %v1892_v50  ;;  %v2939_v50 = vld [vmem:[%s3095_s6] sm:$0xf] }
 0x254   : > { %v857_v53 = vperm.slane %v2939_v50, 0  ;;  %v858_v54 = vperm.slane %v2939_v50, 1 }
 0x256   : > { %1069 = vmatpush.bf16.msrb.mxu3 %v1985_v62  ;;  %v1901_v62 = vor.u32 %v2247_v60, %v1900_v59 }
 0x2d0   : > { %v682_v1 = vpop.f32.mrf.mxu3 }
 0x2d8   : > { %v684_v2 = vpop.f32.mrf.mxu3 }
 0x2d9   : > { %v687_v3 = vpack.c.bf16 %v684_v2, %v682_v1  ;;  %v2260_v1 = vld [vmem:[%s3094_s5 + $0x84] sm:$0xf]  ;;  %v1957_v2 = vor.u32 %v2262_v0, %v1956_v63  ;;  %v1902_v63 = vld [vmem:[%s3094_s5 + $0x18] sm:$0xf0] }
 0x2db   : > { %761 = vmatmul.bf16.vlgmr.msra.gmra.mxu3 %v687_v3  ;;  %v1958_v3 = vld [vmem:[%s3094_s5 + $0x90] sm:$0xf0]  ;;  %1028 = vmatpush.bf16.msrb.mxu0 %v1957_v2 }
 0x2df   : > { %1029 = vmatpush.bf16.msrb.mxu0 %v1941_v15 }
 0x2e3   : > { %1030 = vmatpush.bf16.msrb.mxu0 %v1925_v28 }
 0x2e7   : > { %1031 = vmatpush.bf16.msrb.mxu0 %v1909_v40  ;;  %v2297_v40 = vld [vmem:[%s3096_s7 + $0xa8] sm:$0xff] }
 0x2eb   : > { %1032 = vmatpush.bf16.msrb.mxu0 %v1893_v57  ;;  %v2294_v57 = vld [vmem:[%s3096_s7 + $0x90] sm:$0xff] }
 0x35e   : > { %v762_v6 = vpop.f32.mrf.mxu3 }
 0x35f   : > { %v763_v7 = vadd.f32 %v762_v6, %v704_v5  ;;  %v2263_v6 = vld [vmem:[%s3094_s5 + $0x94] sm:$0xf0] }
 0x361   : > { %v767_v8 = vadd.f32 %v763_v7, %v2552_v47  ;;  %v1961_v7 = vor.u32 %v2260_v1, %v1958_v3  ;;  %v1905_v1 = vor.u32 %v2245_v61, %v1902_v63  ;;  %v2276_v63 = vld [vmem:[%s3096_s7] sm:$0xff] }
 0x363   : > { %769 = vadd.xlane.f32.xlu2 %v767_v8  ;;  %1042 = vmatpush.bf16.msrb.mxu1 %v1961_v7 }
 0x366   : > { %v764_v9 = vpop.f32.mrf.mxu3 }
 0x367   : > { %v765_v10 = vadd.f32 %v764_v9, %v704_v5  ;;  %v1964_v5 = vld [vmem:[%s3094_s5 + $0x88] sm:$0xf]  ;;  %v2261_v9 = vld [vmem:[%s3094_s5 + $0x8c] sm:$0xf] }
 0x369   : > { %v768_v11 = vadd.f32 %v765_v10, %v2554_v48  ;;  %v1966_v10 = vld [vmem:[%s3094_s5 + $0x98] sm:$0xf0] }
 0x36b   : > { %771 = vadd.xlane.f32.xlu2 %v768_v11 }
 0x3d6   : > { %v770_v19 = vpop.xlane.xlu2 %769 }
 0x3d7   : > { %v780_v20 = vmul.f32 %v2660_v18, %v770_v19  ;;  %v2259_v19 = vld [vmem:[%s3094_s5 + $0x74] sm:$0xf0] }
 0x3d9   : > { %v2663_v47 = vsub.f32 %v767_v8, %v780_v20  ;;  %v1965_v8 = vor.u32 %v2263_v6, %v1964_v5  ;;  %v1945_v20 = vor.u32 %v2256_v14, %v1942_v16 }
 0x3db   : > { %v784_v21 = vmul.f32 %v2663_v47, %v2663_v47  ;;  %1056 = vmatpush.bf16.msrb.mxu2 %v1965_v8  ;;  %1043 = vmatpush.bf16.msrb.mxu1 %v1945_v20  ;;  %v816_v20 = vperm.slane %v2655_v4, 1 }
 0x3dd   : > { %786 = vadd.xlane.f32.xlu0 %v784_v21  ;;  %v1949_v21 = vor.u32 %v2259_v19, %v1948_v17 }
 0x3de   : > { %v772_v48 = vpop.xlane.xlu2 %771 }
 0x3df   : > { %v781_v22 = vmul.f32 %v2660_v18, %v772_v48  ;;  %v2257_v48 = vld [vmem:[%s3094_s5 + $0x6c] sm:$0xf]  ;;  %1057 = vmatpush.bf16.msrb.mxu2 %v1949_v21  ;;  %1044 = vmatpush.bf16.msrb.mxu1 %v1929_v32  ;;  %v2299_v32 = vld [vmem:[%s3096_s7 + $0xb8] sm:$0xff] }
 0x3e1   : > { %v2668_v23 = vsub.f32 %v768_v11, %v781_v22  ;;  %v1969_v11 = vor.u32 %v2261_v9, %v1966_v10  ;;  %v1950_v22 = vld [vmem:[%s3094_s5 + $0x78] sm:$0xf0] }
 0x3e3   : > { %v785_v24 = vmul.f32 %v2668_v23, %v2668_v23  ;;  %1070 = vmatpush.bf16.msrb.mxu3 %v1969_v11  ;;  %1058 = vmatpush.bf16.msrb.mxu2 %v1933_v33  ;;  %v2307_v33 = vld [vmem:[%s3096_s7 + $0xf8] sm:$0xff] }
 0x3e4   : > { %1045 = vmatpush.bf16.msrb.mxu1 %v1913_v44  ;;  %v2296_v44 = vld [vmem:[%s3096_s7 + $0xa0] sm:$0xff] }
 0x3e5   : > { %788 = vadd.xlane.f32.xlu1 %v785_v24  ;;  %v1953_v24 = vor.u32 %v2257_v48, %v1950_v22 }
 0x3e7   : > { %1071 = vmatpush.bf16.msrb.mxu3 %v1953_v24  ;;  %1059 = vmatpush.bf16.msrb.mxu2 %v1917_v45  ;;  %v2304_v45 = vld [vmem:[%s3096_s7 + $0xe0] sm:$0xff] }
 0x3e8   : > { %1046 = vmatpush.bf16.msrb.mxu1 %v1897_v58  ;;  %v2302_v58 = vld [vmem:[%s3096_s7 + $0xd0] sm:$0xff] }
 0x3eb   : > { %1072 = vmatpush.bf16.msrb.mxu3 %v1937_v36  ;;  %1060 = vmatpush.bf16.msrb.mxu2 %v1901_v62  ;;  %v2298_v36 = vld [vmem:[%s3096_s7 + $0xb0] sm:$0xff] }
 0x3ef   : > { %1073 = vmatpush.bf16.msrb.mxu3 %v1921_v52  ;;  %1442 = vmatpush.bf16.msra.mxu2 %v2299_v32  ;;  %v2303_v52 = vld [vmem:[%s3096_s7 + $0xd8] sm:$0xff] }
 0x3f3   : > { %1074 = vmatpush.bf16.msrb.mxu3 %v1905_v1  ;;  %1443 = vmatpush.bf16.msra.mxu2 %v2298_v36 }
 0x3f7   : > { %1456 = vmatpush.bf16.msra.mxu3 %v2307_v33  ;;  %1444 = vmatpush.bf16.msra.mxu2 %v2297_v40 }
 0x3fb   : > { %1457 = vmatpush.bf16.msra.mxu3 %v2306_v37  ;;  %1445 = vmatpush.bf16.msra.mxu2 %v2296_v44 }
 0x3ff   : > { %1458 = vmatpush.bf16.msra.mxu3 %v2305_v41 }
 0x403   : > { %1459 = vmatpush.bf16.msra.mxu3 %v2304_v45 }
 0x407   : > { %1460 = vmatpush.bf16.msra.mxu3 %v2303_v52 }
 0x40b   : > { %1461 = vmatpush.bf16.msra.mxu3 %v2302_v58 }
 0x450   : > { %v787_v51 = vpop.xlane.xlu0 %786 }
 0x451   : > { %v790_v56 = vmul.f32 %v787_v51, %v2660_v18  ;;  %v2295_v51 = vld [vmem:[%s3096_s7 + $0x98] sm:$0xff] }
 0x452   : > { %1446 = vmatpush.bf16.msra.mxu2 %v2295_v51 }
 0x453   : > { %v792_v0 = vadd.f32 1e-12, %v790_v56  ;;  %v2285_v56 = vld [vmem:[%s3096_s7 + $0x48] sm:$0xff] }
 0x455   : > { %2343 = vrsqrt.f32 %v792_v0  ;;  %vm800_vm3 = vweird.f32 %v792_v0 }
 0x456   : > { %1447 = vmatpush.bf16.msra.mxu2 %v2294_v57 }
 0x458   : > { %v789_v2 = vpop.xlane.xlu1 %788 }
 0x459   : > { %v791_v3 = vmul.f32 %v789_v2, %v2660_v18 }
 0x45b   : > { %v2344_v5 = vpop.eup %2343  ;;  %v793_v6 = vadd.f32 1e-12, %v791_v3  ;;  %v2293_v3 = vld [vmem:[%s3096_s7 + $0x88] sm:$0xff] }
 0x45c   : > { %v795_v7 = vmul.f32 %v2344_v5, %v792_v0  ;;  %vm801_vm2 = vweird.f32 %v2344_v5  ;;  %v2284_v0 = vld [vmem:[%s3096_s7 + $0x40] sm:$0xff]  ;;  %1448 = vmatpush.bf16.msra.mxu2 %v2293_v3 }
 0x45d   : > { %2345 = vrsqrt.f32 %v793_v6  ;;  %vm802_vm4 = vmor %vm800_vm3, %vm801_vm2  ;;  %vm810_vm6 = vweird.f32 %v793_v6 }
 0x45e   : > { %v796_v8 = vmul.f32 %v2344_v5, %v795_v7  ;;  %v860_v7 = vperm.slane %v2939_v50, 3 }
 0x460   : > { %v797_v9 = vmul.f32 0.5, %v796_v8 }
 0x462   : > { %v798_v10 = vsub.f32 1.5, %v797_v9 }
 0x463   : > { %v2346_v11 = vpop.eup %2345 }
 0x464   : > { %v799_v12 = vmul.f32 %v2344_v5, %v798_v10  ;;  %v805_v13 = vmul.f32 %v2346_v11, %v793_v6  ;;  %vm811_vm5 = vweird.f32 %v2346_v11  ;;  %v859_v6 = vperm.slane %v2939_v50, 2 }
 0x465   : > { %vm812_vm7 = vmor %vm810_vm6, %vm811_vm5 }
 0x466   : > { %v806_v14 = vmul.f32 %v2346_v11, %v805_v13  ;;  %v803_v15 = vsel %vm802_vm4, %v2344_v5, %v799_v12  ;;  %v2301_v5 = vld [vmem:[%s3096_s7 + $0xc8] sm:$0xff] }
 0x467   : > { %v814_v19 = vmul.f32 %v803_v15, %v2663_v47  ;;  %v2283_v47 = vld [vmem:[%s3096_s7 + $0x38] sm:$0xff]  ;;  %1462 = vmatpush.bf16.msra.mxu3 %v2301_v5  ;;  %v2300_v15 = vld [vmem:[%s3096_s7 + $0xc0] sm:$0xff] }
 0x468   : > { %v807_v16 = vmul.f32 0.5, %v806_v14  ;;  %1414 = vmatpush.bf16.msra.mxu0 %v2283_v47  ;;  %v2292_v14 = vld [vmem:[%s3096_s7 + $0x80] sm:$0xff] }
 0x469   : > { %v817_v24 = vmul.f32 %v816_v20, %v814_v19  ;;  %1449 = vmatpush.bf16.msra.mxu2 %v2292_v14 }
 0x46a   : > { %v808_v17 = vsub.f32 1.5, %v807_v16 }
 0x46b   : > { %v2870_v27 = vadd.f32 %v819_v25, %v817_v24  ;;  %1463 = vmatpush.bf16.msra.mxu3 %v2300_v15 }
 0x46c   : > { %v809_v21 = vmul.f32 %v2346_v11, %v808_v17  ;;  %1415 = vmatpush.bf16.msra.mxu0 %v2282_v30 }
 0x46e   : > { %v813_v48 = vsel %vm812_vm7, %v2346_v11, %v809_v21 }
 0x46f   : > { %v815_v22 = vmul.f32 %v813_v48, %v2668_v23  ;;  %v2291_v23 = vld [vmem:[%s3096_s7 + $0x78] sm:$0xff] }
 0x470   : > { %1428 = vmatpush.bf16.msra.mxu1 %v2291_v23  ;;  %1416 = vmatpush.bf16.msra.mxu0 %v2281_v34 }
 0x471   : > { %v818_v26 = vmul.f32 %v816_v20, %v815_v22 }
 0x473   : > { %v2872_v28 = vadd.f32 %v819_v25, %v818_v26 }
 0x474   : > { %1429 = vmatpush.bf16.msra.mxu1 %v2290_v31  ;;  %1417 = vmatpush.bf16.msra.mxu0 %v2280_v38 }
 0x475   : > { %v822_v29 = vpack.c.bf16 %v2872_v28, %v2870_v27 }
 0x477   : > { %1033 = vmatmul.bf16.vlgmr.msrb.gmra.mxu0 %v822_v29  ;;  %1047 = vmatmul.bf16.vlgmr.msrb.gmra.mxu1 %v822_v29 }
 0x478   : > { %1061 = vmatmul.bf16.vlgmr.msrb.gmra.mxu2 %v822_v29  ;;  %1075 = vmatmul.bf16.vlgmr.msrb.gmra.mxu3 %v822_v29 }
 0x479   : > { %1430 = vmatpush.bf16.msra.mxu1 %v2289_v35  ;;  %1418 = vmatpush.bf16.msra.mxu0 %v2279_v42 }
 0x47d   : > { %1431 = vmatpush.bf16.msra.mxu1 %v2288_v39  ;;  %1419 = vmatpush.bf16.msra.mxu0 %v2278_v46 }
 0x481   : > { %1432 = vmatpush.bf16.msra.mxu1 %v2287_v43  ;;  %1420 = vmatpush.bf16.msra.mxu0 %v2277_v55 }
 0x485   : > { %1433 = vmatpush.bf16.msra.mxu1 %v2286_v49  ;;  %1421 = vmatpush.bf16.msra.mxu0 %v2276_v63 }
 0x489   : > { %1434 = vmatpush.bf16.msra.mxu1 %v2285_v56 }
 0x48d   : > { %1435 = vmatpush.bf16.msra.mxu1 %v2284_v0 }
 0x4f4   : > { %v1034_v59 = vpop.f32.mrf.mxu0  ;;  %v1048_v60 = vpop.f32.mrf.mxu1 }
 0x4f5   : > { %v2961_v61 = vadd.f32 %v1034_v59, %v857_v53  ;;  %v2963_v62 = vadd.f32 %v1048_v60, %v858_v54 }
 0x4f7   : > { %v1081_v1 = vmul.f32 %v2961_v61, %v2961_v61  ;;  %v1082_v2 = vmul.f32 %v2963_v62, %v2963_v62 }
 0x4f9   : > { %v1089_v8 = vmul.f32 %v1081_v1, %v2961_v61  ;;  %v1090_v9 = vmul.f32 %v1082_v2, %v2963_v62 }
 0x4fb   : > { %v1097_v10 = vmul.f32 0.044715, %v1089_v8  ;;  %v1098_v11 = vmul.f32 0.044715, %v1090_v9  ;;  %v1062_v12 = vpop.f32.mrf.mxu2  ;;  %v1076_v13 = vpop.f32.mrf.mxu3 }
 0x4fc   : > { %v2991_v16 = vadd.f32 %v1062_v12, %v859_v6  ;;  %v2993_v17 = vadd.f32 %v1076_v13, %v860_v7  ;;  %v1036_v19 = vpop.f32.mrf.mxu0  ;;  %v1050_v20 = vpop.f32.mrf.mxu1 }
 0x4fd   : > { %v1105_v21 = vadd.f32 %v1097_v10, %v2961_v61  ;;  %v1106_v48 = vadd.f32 %v1098_v11, %v2963_v62  ;;  %v2997_v22 = vadd.f32 %v1036_v19, %v857_v53  ;;  %v2999_v24 = vadd.f32 %v1050_v20, %v858_v54 }
 0x4fe   : > { %v1083_v25 = vmul.f32 %v2991_v16, %v2991_v16  ;;  %v1084_v26 = vmul.f32 %v2993_v17, %v2993_v17 }
 0x4ff   : > { %v1113_v29 = vmul.f32 0.7978846, %v1105_v21  ;;  %v1085_v47 = vmul.f32 %v2997_v22, %v2997_v22  ;;  %v1086_v23 = vmul.f32 %v2999_v24, %v2999_v24  ;;  %v1114_v32 = vmul.f32 0.7978846, %v1106_v48 }
 0x500   : > { %v1091_v30 = vmul.f32 %v1083_v25, %v2991_v16  ;;  %v1092_v31 = vmul.f32 %v1084_v26, %v2993_v17 }
 0x501   : > { %v1093_v33 = vmul.f32 %v1085_v47, %v2997_v22  ;;  %v1094_v34 = vmul.f32 %v1086_v23, %v2999_v24  ;;  %2347 = vtanh.f32 %v1113_v29 }
 0x502   : > { %v1099_v35 = vmul.f32 0.044715, %v1091_v30  ;;  %v1100_v36 = vmul.f32 0.044715, %v1092_v31  ;;  %2349 = vtanh.f32 %v1114_v32 }
 0x503   : > { %v1101_v37 = vmul.f32 0.044715, %v1093_v33  ;;  %v1102_v38 = vmul.f32 0.044715, %v1094_v34  ;;  %v1064_v39 = vpop.f32.mrf.mxu2  ;;  %v1078_v40 = vpop.f32.mrf.mxu3 }
 0x504   : > { %v1107_v41 = vadd.f32 %v1099_v35, %v2991_v16  ;;  %v1108_v42 = vadd.f32 %v1100_v36, %v2993_v17  ;;  %v1065_v43 = vadd.f32 %v1064_v39, %v859_v6  ;;  %v1079_v44 = vadd.f32 %v1078_v40, %v860_v7 }
 0x505   : > { %v1109_v45 = vadd.f32 %v1101_v37, %v2997_v22  ;;  %v1110_v46 = vadd.f32 %v1102_v38, %v2999_v24  ;;  %v1221_v40 = vperm.slane %v2655_v4, 3 }
 0x506   : > { %v1115_v49 = vmul.f32 0.7978846, %v1107_v41  ;;  %v1116_v50 = vmul.f32 0.7978846, %v1108_v42  ;;  %v1087_v51 = vmul.f32 %v1065_v43, %v1065_v43  ;;  %v1088_v52 = vmul.f32 %v1079_v44, %v1079_v44 }
 0x507   : > { %v1117_v53 = vmul.f32 0.7978846, %v1109_v45  ;;  %v1118_v54 = vmul.f32 0.7978846, %v1110_v46  ;;  %v2348_v57 = vpop.eup %2347 }
 0x508   : > { %2351 = vtanh.f32 %v1115_v49  ;;  %v1095_v55 = vmul.f32 %v1087_v51, %v1065_v43  ;;  %v1096_v56 = vmul.f32 %v1088_v52, %v1079_v44  ;;  %v2350_v60 = vpop.eup %2349  ;;  %v1129_v1 = vadd.f32 1.0, %v2348_v57 }
 0x509   : > { %2353 = vtanh.f32 %v1116_v50  ;;  %v1130_v3 = vadd.f32 1.0, %v2350_v60 }
 0x50a   : > { %2355 = vtanh.f32 %v1117_v53  ;;  %v1103_v58 = vmul.f32 0.044715, %v1095_v55  ;;  %v1104_v59 = vmul.f32 0.044715, %v1096_v56  ;;  %v1137_v10 = vmul.f32 0.5, %v1129_v1 }
 0x50b   : > { %2357 = vtanh.f32 %v1118_v54  ;;  %v1138_v12 = vmul.f32 0.5, %v1130_v3  ;;  %v2315_v3 = vld [vmem:[%s3097_s8 + $0x38] sm:$0xff] }
 0x50c   : > { %v1111_v63 = vadd.f32 %v1103_v58, %v1065_v43  ;;  %v1112_v0 = vadd.f32 %v1104_v59, %v1079_v44  ;;  %v1145_v21 = vmul.f32 %v1137_v10, %v2961_v61  ;;  %1584 = vmatpush.bf16.msrb.mxu0 %v2315_v3 }
 0x50d   : > { %v1146_v26 = vmul.f32 %v1138_v12, %v2963_v62  ;;  %v2308_v12 = vld [vmem:[%s3097_s8] sm:$0xff] }
 0x50e   : > { %v2352_v2 = vpop.eup %2351  ;;  %v1119_v5 = vmul.f32 0.7978846, %v1111_v63  ;;  %v1120_v6 = vmul.f32 0.7978846, %v1112_v0 }
 0x50f   : > { %v2354_v7 = vpop.eup %2353  ;;  %v1131_v14 = vadd.f32 1.0, %v2352_v2 }
 0x510   : > { %v2356_v8 = vpop.eup %2355  ;;  %2359 = vtanh.f32 %v1119_v5  ;;  %v1132_v19 = vadd.f32 1.0, %v2354_v7  ;;  %v2313_v5 = vld [vmem:[%s3097_s8 + $0x28] sm:$0xff]  ;;  %v2311_v7 = vld [vmem:[%s3097_s8 + $0x18] sm:$0xff] }
 0x511   : > { %v2358_v9 = vpop.eup %2357  ;;  %v1133_v11 = vadd.f32 1.0, %v2356_v8  ;;  %2361 = vtanh.f32 %v1120_v6  ;;  %v1139_v23 = vmul.f32 0.5, %v1131_v14  ;;  %v2312_v6 = vld [vmem:[%s3097_s8 + $0x20] sm:$0xff]  ;;  %v2310_v8 = vld [vmem:[%s3097_s8 + $0x10] sm:$0xff]  ;;  %v2323_v14 = vld [vmem:[%s3098_s9 + $0x38] sm:$0xff] }
 0x512   : > { %v1134_v13 = vadd.f32 1.0, %v2358_v9  ;;  %v1140_v32 = vmul.f32 0.5, %v1132_v19  ;;  %v2309_v9 = vld [vmem:[%s3097_s8 + $0x8] sm:$0xff]  ;;  %1666 = vmatpush.bf16.msrb.mxu1 %v2323_v14 }
 0x513   : > { %v1141_v15 = vmul.f32 0.5, %v1133_v11  ;;  %v1147_v61 = vmul.f32 %v1139_v23, %v2991_v16 }
 0x514   : > { %v1142_v20 = vmul.f32 0.5, %v1134_v13 }
 0x515   : > { %v1149_v48 = vmul.f32 %v1141_v15, %v2997_v22  ;;  %v1148_v22 = vmul.f32 %v1140_v32, %v2993_v17 }
 0x516   : > { %v2360_v25 = vpop.eup %2359  ;;  %v1150_v29 = vmul.f32 %v1142_v20, %v2999_v24  ;;  %v2322_v20 = vld [vmem:[%s3098_s9 + $0x30] sm:$0xff] }
 0x517   : > { %v2362_v47 = vpop.eup %2361  ;;  %v1135_v30 = vadd.f32 1.0, %v2360_v25  ;;  %v1153_v31 = vpack.c.bf16 %v1149_v48, %v1145_v21  ;;  %1667 = vmatpush.bf16.msrb.mxu1 %v2322_v20 }
 0x518   : > { %v1136_v33 = vadd.f32 1.0, %v2362_v47  ;;  %v1154_v34 = vpack.c.bf16 %v1150_v29, %v1146_v26  ;;  %v2321_v26 = vld [vmem:[%s3098_s9 + $0x28] sm:$0xff] }
 0x519   : > { %v1143_v35 = vmul.f32 0.5, %v1135_v30  ;;  %1422 = vmatmul.bf16.vlgmr.msra.gmra.mxu0 %v1153_v31 }
 0x51a   : > { %v1144_v36 = vmul.f32 0.5, %v1136_v33  ;;  %1436 = vmatmul.bf16.vlgmr.msra.gmra.mxu1 %v1154_v34 }
 0x51b   : > { %v1151_v37 = vmul.f32 %v1143_v35, %v1065_v43  ;;  %1668 = vmatpush.bf16.msrb.mxu1 %v2321_v26 }
 0x51c   : > { %v1152_v38 = vmul.f32 %v1144_v36, %v1079_v44 }
 0x51d   : > { %v1155_v62 = vpack.c.bf16 %v1151_v37, %v1147_v61  ;;  %v1512_v61 = vperm.slane %v2655_v4, 4 }
 0x51e   : > { %v1156_v39 = vpack.c.bf16 %v1152_v38, %v1148_v22 }
 0x51f   : > { %1450 = vmatmul.bf16.vlgmr.msra.gmra.mxu2 %v1155_v62 }
 0x520   : > { %1464 = vmatmul.bf16.vlgmr.msra.gmra.mxu3 %v1156_v39  ;;  %v1515_v39 = vperm.slane %v2655_v4, 5 }
 0x596   : > { %v1423_v24 = vpop.f32.mrf.mxu0 }
 0x597   : > { %v1424_v41 = vadd.f32 %v1423_v24, %v1221_v40  ;;  %v1437_v42 = vpop.f32.mrf.mxu1 }
 0x599   : > { %v1438_v45 = vadd.f32 %v1437_v42, %v1424_v41 }
 0x59e   : > { %v1425_v46 = vpop.f32.mrf.mxu0 }
 0x59f   : > { %v1426_v52 = vadd.f32 %v1425_v46, %v1221_v40  ;;  %v1439_v17 = vpop.f32.mrf.mxu1  ;;  %v2319_v46 = vld [vmem:[%s3098_s9 + $0x18] sm:$0xff] }
 0x5a1   : > { %v1440_v44 = vadd.f32 %v1439_v17, %v1426_v52 }
 0x5a2   : > { %v1451_v49 = vpop.f32.mrf.mxu2 }
 0x5a3   : > { %v1452_v50 = vadd.f32 %v1451_v49, %v1438_v45  ;;  %v1465_v51 = vpop.f32.mrf.mxu3  ;;  %v2320_v45 = vld [vmem:[%s3098_s9 + $0x20] sm:$0xff]  ;;  %v2318_v49 = vld [vmem:[%s3098_s9 + $0x10] sm:$0xff] }
 0x5a4   : > { %1669 = vmatpush.bf16.msrb.mxu1 %v2320_v45 }
 0x5a5   : > { %v1466_v16 = vadd.f32 %v1465_v51, %v1452_v50  ;;  %v2317_v50 = vld [vmem:[%s3098_s9 + $0x8] sm:$0xff]  ;;  %v2316_v51 = vld [vmem:[%s3098_s9] sm:$0xff] }
 0x5a7   : > { %v1470_v43 = vadd.f32 %v1466_v16, %v2870_v27  ;;  %v1535_v16 = vperm.slane %v2655_v4, 6 }
 0x5a8   : > { %1670 = vmatpush.bf16.msrb.mxu1 %v2319_v46 }
 0x5a9   : > { %1472 = vadd.xlane.f32.xlu2 %v1470_v43 }
 0x5aa   : > { %v1453_v53 = vpop.f32.mrf.mxu2 }
 0x5ab   : > { %v1454_v54 = vadd.f32 %v1453_v53, %v1440_v44  ;;  %v1467_v55 = vpop.f32.mrf.mxu3 }
 0x5ac   : > { %1671 = vmatpush.bf16.msrb.mxu1 %v2318_v49 }
 0x5ad   : > { %v1468_v56 = vadd.f32 %v1467_v55, %v1454_v54 }
 0x5af   : > { %v1471_v57 = vadd.f32 %v1468_v56, %v2872_v28  ;;  %v2314_v28 = vld [vmem:[%s3097_s8 + $0x30] sm:$0xff]  ;;  %v1617_v56 = vperm.slane %v2655_v4, 7 }
 0x5b0   : > { %1585 = vmatpush.bf16.msrb.mxu0 %v2314_v28  ;;  %1672 = vmatpush.bf16.msrb.mxu1 %v2317_v50 }
 0x5b1   : > { %1474 = vadd.xlane.f32.xlu0 %v1471_v57 }
 0x5b4   : > { %1586 = vmatpush.bf16.msrb.mxu0 %v2313_v5  ;;  %1673 = vmatpush.bf16.msrb.mxu1 %v2316_v51 }
 0x5b8   : > { %1587 = vmatpush.bf16.msrb.mxu0 %v2312_v6 }
 0x5bc   : > { %1588 = vmatpush.bf16.msrb.mxu0 %v2311_v7 }
 0x5c0   : > { %1589 = vmatpush.bf16.msrb.mxu0 %v2310_v8 }
 0x5c4   : > { %1590 = vmatpush.bf16.msrb.mxu0 %v2309_v9 }
 0x5c8   : > { %1591 = vmatpush.bf16.msrb.mxu0 %v2308_v12 }
 0x61c   : > { %v1473_v58 = vpop.xlane.xlu2 %1472 }
 0x61d   : > { %v1476_v59 = vmul.f32 %v1473_v58, %v2660_v18 }
 0x61f   : > { %v1478_v60 = vsub.f32 %v1470_v43, %v1476_v59 }
 0x621   : > { %v1480_v63 = vmul.f32 %v1478_v60, %v1478_v60 }
 0x623   : > { %1482 = vadd.xlane.f32.xlu1 %v1480_v63 }
 0x624   : > { %v1475_v0 = vpop.xlane.xlu0 %1474 }
 0x625   : > { %v1477_v1 = vmul.f32 %v1475_v0, %v2660_v18 }
 0x627   : > { %v1479_v27 = vsub.f32 %v1471_v57, %v1477_v1 }
 0x629   : > { %v1481_v2 = vmul.f32 %v1479_v27, %v1479_v27 }
 0x62b   : > { %1484 = vadd.xlane.f32.xlu2 %v1481_v2 }
 0x696   : > { %v1483_v10 = vpop.xlane.xlu1 %1482 }
 0x697   : > { %v1486_v11 = vmul.f32 %v1483_v10, %v2660_v18 }
 0x699   : > { %v1488_v13 = vadd.f32 1e-12, %v1486_v11 }
 0x69b   : > { %2363 = vrsqrt.f32 %v1488_v13  ;;  %vm1496_vm9 = vweird.f32 %v1488_v13 }
 0x69e   : > { %v1485_v15 = vpop.xlane.xlu2 %1484 }
 0x69f   : > { %v1487_v19 = vmul.f32 %v1485_v15, %v2660_v18 }
 0x6a1   : > { %v2364_v21 = vpop.eup %2363  ;;  %v1489_v48 = vadd.f32 1e-12, %v1487_v19 }
 0x6a2   : > { %v1491_v25 = vmul.f32 %v2364_v21, %v1488_v13  ;;  %vm1497_vm8 = vweird.f32 %v2364_v21 }
 0x6a3   : > { %2365 = vrsqrt.f32 %v1489_v48  ;;  %vm1498_vm10 = vmor %vm1496_vm9, %vm1497_vm8  ;;  %vm1506_vm12 = vweird.f32 %v1489_v48 }
 0x6a4   : > { %v1492_v29 = vmul.f32 %v2364_v21, %v1491_v25 }
 0x6a6   : > { %v1493_v47 = vmul.f32 0.5, %v1492_v29 }
 0x6a8   : > { %v1494_v23 = vsub.f32 1.5, %v1493_v47 }
 0x6a9   : > { %v2366_v30 = vpop.eup %2365 }
 0x6aa   : > { %v1495_v18 = vmul.f32 %v2364_v21, %v1494_v23  ;;  %v1501_v31 = vmul.f32 %v2366_v30, %v1489_v48  ;;  %vm1507_vm11 = vweird.f32 %v2366_v30 }
 0x6ab   : > { %vm1508_vm13 = vmor %vm1506_vm12, %vm1507_vm11 }
 0x6ac   : > { %v1502_v32 = vmul.f32 %v2366_v30, %v1501_v31  ;;  %v1499_v33 = vsel %vm1498_vm10, %v2364_v21, %v1495_v18 }
 0x6ad   : > { %v1510_v36 = vmul.f32 %v1499_v33, %v1478_v60 }
 0x6ae   : > { %v1503_v34 = vmul.f32 0.5, %v1502_v32 }
 0x6af   : > { %v1513_v62 = vmul.f32 %v1512_v61, %v1510_v36 }
 0x6b0   : > { %v1504_v35 = vsub.f32 1.5, %v1503_v34 }
 0x6b1   : > { %v1516_v40 = vadd.f32 %v1515_v39, %v1513_v62 }
 0x6b2   : > { %v1505_v37 = vmul.f32 %v2366_v30, %v1504_v35 }
 0x6b4   : > { %v1509_v22 = vsel %vm1508_vm13, %v2366_v30, %v1505_v37 }
 0x6b5   : > { %v1511_v38 = vmul.f32 %v1509_v22, %v1479_v27 }
 0x6b7   : > { %v1514_v24 = vmul.f32 %v1512_v61, %v1511_v38 }
 0x6b9   : > { %v1517_v41 = vadd.f32 %v1515_v39, %v1514_v24 }
 0x6bb   : > { %v1518_v42 = vpack.c.bf16 %v1517_v41, %v1516_v40 }
 0x6bd   : > { %1592 = vmatmul.bf16.vlgmr.msrb.gmra.mxu0 %v1518_v42 }
 0x73a   : > { %v1593_v52 = vpop.f32.mrf.mxu0 }
 0x73b   : > { %v1594_v43 = vadd.f32 %v1593_v52, %v1535_v16 }
 0x73d   : > { %2367 = vtanh.f32 %v1594_v43 }
 0x742   : > { %v1595_v17 = vpop.f32.mrf.mxu0 }
 0x743   : > { %v1596_v44 = vadd.f32 %v1595_v17, %v1535_v16  ;;  %v2368_v53 = vpop.eup %2367 }
 0x745   : > { %2369 = vtanh.f32 %v1596_v44 }
 0x74b   : > { %v2370_v54 = vpop.eup %2369 }
 0x74c   : > { %v1600_v55 = vpack.c.bf16 %v2370_v54, %v2368_v53 }
 0x74e   : > { %1674 = vmatmul.bf16.vlgmr.msrb.gmra.mxu1 %v1600_v55 }
 0x7cb   : > { %v1675_v57 = vpop.f32.mrf.mxu1 }
 0x7cc   : > { %v1676_v58 = vadd.f32 %v1675_v57, %v1617_v56 }
 0x7ce   : > { %1680 = vst [vmem:[%s410_s30] sm:$0xff] %v1676_v58 }
 0x7d3   : > { %v1677_v59 = vpop.f32.mrf.mxu1 }
 0x7d4   : > { %v1678_v60 = vadd.f32 %v1677_v59, %v1617_v56 }
 0x7d6   : > { %1681 = vst [vmem:[%s410_s30 + $0x8] sm:$0xff] %v1678_v60 }
 0x7d7 PF: > { %s21_s17 = sadd.s32 1, %s2377_s17  }
 0x7d8   : > { %p18_p4 = scmp.ge.s32.totalorder %s21_s17, 4  }
 0x7da   :  { %20 = sbr.rel (!%p18_p4) target bundleno = 1 (0x1), region = 97 }

</bundles_post_ra>
